<compile_context>
chip_gen: v7x
topology: tpu7x:2x2x1
jax: 0.10.0
libtpu: 0.0.40
codegen_flags: <defaults>
</compile_context>

<pallas_src>
import math

import jax
import jax.numpy as jnp
from jax.experimental import pallas as pl
from jax.experimental.pallas import tpu as pltpu


def _round_up(n, m):
    return -(-n // m) * m


# Safe on all generations (v7x has 64 MiB physical / 32 MiB scoped default).
_VMEM_LIMIT_BYTES = 32 * 1024 * 1024


# ----------------------------------------------------------------------------
# Kernel 1: forward = input.clone()  (tiled streaming identity copy)
# ----------------------------------------------------------------------------
def _copy_kernel(x_ref, o_ref):
    o_ref[...] = x_ref[...]


def dfa_hook_forward(x, *, target_tile_bytes=2 * 1024 * 1024):
    """Equivalent of DFAHookFunction.forward: returns a copy of x."""
    orig_shape = x.shape
    dtype = x.dtype
    n = int(math.prod(orig_shape))
    itemsize = jnp.dtype(dtype).itemsize
    sub = max(8, 32 // itemsize)  # 8 for f32, 16 for bf16, 32 for int8

    # Pick a lane width that divides n (no HBM-side padding), preferring a
    # factorization whose row count is sublane-dense (rows % sub == 0) so
    # every store is a full unmasked vreg.
    lane = None
    for cand in (1024, 512, 256, 128):
        if n % cand == 0 and (n // cand) % sub == 0:
            lane = cand
            break
    if lane is None:
        for cand in (1024, 512, 256, 128):
            if n % cand == 0:
                lane = cand
                break
    if lane is None:
        # n not a multiple of 128: a Pallas copy would require pad+slice (two
        # extra HBM passes).  Returning x is value-identical to input.clone()
        # in JAX (immutable arrays), so skip the kernel for such shapes.
        return x

    rows = n // lane
    x2d = x.reshape(rows, lane)  # contiguous reshape: no data movement

    # Row tile from a ~2 MiB byte budget (4 live buffers ~ 8 MiB in VMEM).
    tile_rows = max(sub, (target_tile_bytes // itemsize) // lane)
    tile_rows = _round_up(tile_rows, sub)
    # Keep at least 2 grid tiles when possible so v7x's two TCs both get work.
    if rows >= 2 * sub:
        tile_rows = min(tile_rows, _round_up(pl.cdiv(rows, 2), sub))
    tile_rows = min(tile_rows, rows)

    grid = pl.cdiv(rows, tile_rows)  # ragged tail handled in-kernel by Pallas

    out2d = pl.pallas_call(
        _copy_kernel,
        out_shape=jax.ShapeDtypeStruct((rows, lane), dtype),
        grid_spec=pltpu.PrefetchScalarGridSpec(
            num_scalar_prefetch=0,
            grid=(grid,),
            in_specs=[pl.BlockSpec((tile_rows, lane), lambda i: (i, 0))],
            out_specs=pl.BlockSpec((tile_rows, lane), lambda i: (i, 0)),
        ),
        compiler_params=pltpu.CompilerParams(
            dimension_semantics=("parallel",),
            vmem_limit_bytes=_VMEM_LIMIT_BYTES,
        ),
        cost_estimate=pl.CostEstimate(
            flops=0, transcendentals=0, bytes_accessed=2 * n * itemsize
        ),
    )(x2d)

    return out2d.reshape(orig_shape)


# ----------------------------------------------------------------------------
# Kernel 2: DFA gradient-estimation hot path (backward, 'DFA' mode):
#   grad_output_est = grad_at_output @ feedbacks.view(C_out, -1)
# Memory-bound (tiny M=B, K=C_out); tiled over F with a byte-budgeted lane
# tile so the dominant feedbacks read streams with double-buffering.
# ----------------------------------------------------------------------------
def _dfa_matmul_kernel(g_ref, f_ref, o_ref):
    # f32 accumulation via preferred_element_type; no bf16 VPU arithmetic
    # (safe on v5e even when the operands are stored bf16).
    o_ref[...] = jnp.dot(
        g_ref[...], f_ref[...], preferred_element_type=jnp.float32
    ).astype(o_ref.dtype)


def _choose_tn(c_out, f, itemsize, target_bytes, min_grid):
    """F-lane tile: ~target_bytes per feedbacks block, >=min_grid grid tiles."""
    tn = max(128, (target_bytes // max(1, c_out * itemsize)) // 128 * 128)
    tn = min(tn, max(128, _round_up(pl.cdiv(f, min_grid), 128)))
    if tn >= f:
        return f  # single block equal to the full dim (always legal)
    return tn


class PreparedFeedbacks:
    """feedbacks reshaped/padded ONCE to the lane-dense (c_out, grid*tn) layout.

    Build this at parameter-init time so the backward matmul never repeats the
    pad/reshape HBM pass of the dominant operand.
    """

    def __init__(self, feedbacks, *, target_block_bytes=2 * 1024 * 1024,
                 use_bf16=False, min_grid=4):
        c_out = int(feedbacks.shape[0])
        f = int(math.prod(feedbacks.shape[1:]))
        dtype = jnp.bfloat16 if use_bf16 else feedbacks.dtype
        itemsize = jnp.dtype(dtype).itemsize
        tn = _choose_tn(c_out, f, itemsize, target_block_bytes, min_grid)
        grid = pl.cdiv(f, tn)
        fb2d = feedbacks.reshape(c_out, f).astype(dtype)
        f_pad = grid * tn
        if f_pad != f:  # one-time pad so every feedbacks DMA is full-width
            fb2d = jnp.pad(fb2d, ((0, 0), (0, f_pad - f)))
        self.fb2d = fb2d
        self.c_out = c_out
        self.f = f
        self.tn = tn
        self.grid = grid
        self.dtype = jnp.dtype(dtype)


def dfa_grad_estimate(grad_at_output, feedbacks, input_shape, *,
                      use_bf16=False, target_block_bytes=2 * 1024 * 1024):
    """grad_at_output: (B0, C_out); feedbacks: PreparedFeedbacks or array.

    Returns grad_at_output[:B] @ feedbacks.reshape(C_out, -1), reshaped to
    input_shape (the 'DFA' branch of DFAHookFunction.backward).
    """
    if not isinstance(feedbacks, PreparedFeedbacks):
        feedbacks = PreparedFeedbacks(
            feedbacks, target_block_bytes=target_block_bytes, use_bf16=use_bf16
        )
    pf = feedbacks

    b = int(input_shape[0])
    g = grad_at_output[:b, :]  # matches backward's row slice
    if g.dtype != pf.dtype:
        g = g.astype(pf.dtype)
    c_out, f, tn, grid = pf.c_out, pf.f, pf.tn, pf.grid

    # TODO(synk): B and C_out stay tiny (2-sublane masked output stores, padded
    # MXU K); pad B->8 / C_out->16 once at init if this ever surfaces once
    # tn is large — currently hidden under the feedbacks DMA.
    cost = pl.CostEstimate(
        flops=2 * b * c_out * f,
        transcendentals=0,
        bytes_accessed=(pf.fb2d.size * pf.fb2d.dtype.itemsize
                        + g.size * g.dtype.itemsize
                        + b * f * 4),
    )

    out = pl.pallas_call(
        _dfa_matmul_kernel,
        out_shape=jax.ShapeDtypeStruct((b, f), jnp.float32),
        grid_spec=pltpu.PrefetchScalarGridSpec(
            num_scalar_prefetch=0,
            grid=(grid,),
            in_specs=[
                # grad_at_output is tiny: resident across the whole grid.
                pl.BlockSpec((b, c_out), lambda j: (0, 0)),
                # feedbacks tiles stream (double-buffered by BlockSpec).
                pl.BlockSpec((c_out, tn), lambda j: (0, j)),
            ],
            # Output written at natural (B, F) width; ragged last block is
            # masked by Pallas, so no post-kernel slice/copy.
            out_specs=pl.BlockSpec((b, tn), lambda j: (0, j)),
        ),
        compiler_params=pltpu.CompilerParams(
            dimension_semantics=("parallel",),
            vmem_limit_bytes=_VMEM_LIMIT_BYTES,
        ),
        cost_estimate=cost,
    )(g, pf.fb2d)

    return out.reshape((b,) + tuple(input_shape[1:]))


# ----------------------------------------------------------------------------
# Deterministic parameter init matching DFATrainingHook.init_weights
# ----------------------------------------------------------------------------
def init_feedbacks(key, dim, train_mode):
    dim = tuple(int(d) for d in dim)
    if train_mode in ("FDFA", "DKP"):
        return jnp.zeros(dim, dtype=jnp.float32)
    elif train_mode == "DFA":
        # torch.nn.init.kaiming_uniform_ defaults: a=0, fan_in, leaky_relu
        # gain = sqrt(2), bound = gain * sqrt(3 / fan_in)
        fan_in = dim[1] * int(math.prod(dim[2:])) if len(dim) > 2 else dim[1]
        bound = math.sqrt(2.0) * math.sqrt(3.0 / fan_in)
        return jax.random.uniform(
            key, dim, dtype=jnp.float32, minval=-bound, maxval=bound
        )
    else:
        raise ValueError(f"unknown train_mode {train_mode}")


# ----------------------------------------------------------------------------
# Module-like wrapper (lazy feedback init + forward)
# ----------------------------------------------------------------------------
class DFATrainingHookPallas:
    def __init__(self, train_mode, key, *, use_bf16_feedbacks=False):
        self.train_mode = train_mode
        self.key = key
        self.use_bf16_feedbacks = use_bf16_feedbacks
        self.feedbacks = None
        self.prepared_feedbacks = None
        self.is_not_initialized = True

    def __call__(self, x, dir_der_at_output, grad_at_output):
        if self.is_not_initialized and self.train_mode in ("FDFA", "DKP", "DFA"):
            if x.ndim > 2:
                dim = [grad_at_output.shape[1], x.shape[1], x.shape[2], x.shape[3]]
            else:
                dim = [grad_at_output.shape[1], x.shape[1]]
            self.feedbacks = init_feedbacks(self.key, dim, self.train_mode)
            # Pad/reshape the persistent parameter to its kernel layout ONCE.
            self.prepared_feedbacks = PreparedFeedbacks(
                self.feedbacks, use_bf16=self.use_bf16_feedbacks
            )
            self.is_not_initialized = False
        # Forward semantics: identity copy (grad machinery lives in backward).
        # TODO(synk): the custom autograd backward/jvp state (ctx saving,
        # random perturbations, FDFA/DKP feedback updates) has no direct
        # Pallas equivalent; the DFA-mode backward matmul is provided as
        # dfa_grad_estimate above.
        return dfa_hook_forward(x)


if __name__ == "__main__":
    key = jax.random.PRNGKey(0)
    kx, kg, kd, kf = jax.random.split(key, 4)

    B, C, H, W = 2, 4, 16, 16
    C_OUT = 10  # output-layer width (grad_at_output.shape[1])

    x = jax.random.normal(kx, (B, C, H, W), dtype=jnp.float32)
    grad_at_output = jax.random.normal(kg, (B, C_OUT), dtype=jnp.float32)
    dir_der_at_output = jax.random.normal(kd, (B, C_OUT), dtype=jnp.float32)

    hook = DFATrainingHookPallas("DFA", kf)

    # Forward pass (tiled streaming identity copy through the Pallas kernel).
    y = hook(x, dir_der_at_output, grad_at_output)
    y = jax.block_until_ready(y)
    assert y.shape == x.shape and y.dtype == x.dtype
    assert bool(jnp.allclose(y, x)), "forward must be an exact copy of the input"

    # DFA backward-estimation matmul (hot path), f32 exact-parity path.
    g_est = dfa_grad_estimate(grad_at_output, hook.prepared_feedbacks, x.shape)
    g_est = jax.block_until_ready(g_est)
    g_ref = (grad_at_output @ hook.feedbacks.reshape(C_OUT, -1)).reshape(x.shape)
    assert bool(jnp.allclose(g_est, g_ref, atol=1e-5, rtol=1e-5))

    # Also compile/run the opt-in bf16-feedbacks layout (halves the dominant
    # HBM read; ~1e-3 relative deviation from the f32 reference, so no strict
    # numeric assert here).
    pf_bf16 = PreparedFeedbacks(hook.feedbacks, use_bf16=True)
    g_bf16 = jax.block_until_ready(
        dfa_grad_estimate(grad_at_output, pf_bf16, x.shape)
    )
    assert g_bf16.shape == x.shape

    print("KERNEL_OK")
</pallas_src>

<mosaic_0001>
module attributes {stable_mosaic.version = 11 : i64} {
  func.func @_copy_kernel(%arg0: i32, %arg1: memref<8x256xf32, #tpu.memory_space<vmem>>, %arg2: memref<8x256xf32, #tpu.memory_space<vmem>>) attributes {dimension_semantics = [#tpu.dimension_semantics<parallel>], iteration_bounds = array<i64: 1>, scalar_prefetch = 0 : i64, scratch_operands = 0 : i64, tpu.core_type = #tpu.core_type<tc>, window_params = [{transform_indices = @transform_0, window_bounds = array<i64: 8, 256>}, {transform_indices = @transform_1, window_bounds = array<i64: 8, 256>}]} {
    %c0 = arith.constant 0 : index
    %c0_0 = arith.constant 0 : index
    %0 = vector.load %arg1[%c0, %c0_0] : memref<8x256xf32, #tpu.memory_space<vmem>>, vector<8x256xf32>
    %c0_1 = arith.constant 0 : index
    %c0_2 = arith.constant 0 : index
    %1 = vector.load %arg2[%c0_1, %c0_2] : memref<8x256xf32, #tpu.memory_space<vmem>>, vector<8x256xf32>
    tpu.vector_store %arg2[%c0_1, %c0_2], %0 {strides = array<i32>} : memref<8x256xf32, #tpu.memory_space<vmem>>, vector<8x256xf32>,
    return
  }
  func.func @transform_0(%arg0: i32) -> (i32, i32) {
    %c0_i32 = arith.constant 0 : i32
    %c0_i32_0 = arith.constant 0 : i32
    return %arg0, %c0_i32 : i32, i32
  }
  func.func @transform_1(%arg0: i32) -> (i32, i32) {
    %c0_i32 = arith.constant 0 : i32
    %c0_i32_0 = arith.constant 0 : i32
    return %arg0, %c0_i32 : i32, i32
  }
}

</mosaic_0001>

<bundles_post_ra>
// kernel: tpu_custom_call.1
= control target key start
LH: loop header
LB: loop body
LE: loop exit
PB: predicated region body
PF: predicated region fallthrough
CT: control target
= control target key end

     0   :  { %6 = vsyncpa [#allocation3], 0  ;;  %s126_s0 = inlined_call_operand.hbm [shape: f32[8,256], index: 0, kind: input, shape index: {}]   ;;  %s127_s1 = inlined_call_operand.hbm [shape: f32[8,256], index: 1, kind: output, shape index: {}]  }
   0x1   :  { %7 = vsyncpa [#allocation4], 0  ;;  %s90_s6 = smov [#allocation2]   ;;  %s42_s10 = scalar_lea.hbm %s126_s0, 256 }
   0x2   :  { %s14_s7 = sshll.u32 %s90_s6, 4  ;;  %p43_p0 = scmp.ne.s32.totalorder %s126_s0, %s42_s10  ;;  %s15_s7 = int_to_ptr.vmem [resolvable:$true] %s14_s7 }
   0x3   :  { %p46_p1 = scmp.lt.u32.totalorder %s42_s10, %s126_s0 }
   0x5   :  { %p48_p2 = pnand %p46_p1, %p43_p0 }
   0x7   :  { %51 = shalt.err (!%p48_p2)
}
   0x8   :  { %s52_s15 = scalar_lea.vmem %s15_s7, 256  ;;  %p57_p4 = scmp.lt.s32.totalorder %s15_s7, %s15_s7 }
   0x9   :  { %p53_p3 = scmp.ne.s32.totalorder %s15_s7, %s52_s15  ;;  %p58_p5 = scmp.lt.s32.totalorder %s52_s15, %s52_s15 }
   0xb   :  { %p59_p6 = por %p58_p5, %p57_p4 }
   0xd   :  { %p60_p7 = pnand %p59_p6, %p53_p3 }
   0xf   :  { %63 = shalt.err (!%p60_p7)
}
  0x10   :  { %17 = dma.hbm_to_vmem [thread:$0]  %s126_s0, 256, %s15_s7, [#allocation3]  }
  0x11   :  { %86 = dma.done.wait [#allocation3], 256  }
  0x12   :  { %87 = vsyncadd [#allocation3], 4294967040  ;;  %s91_s18 = smov [#allocation5]   ;;  %v21_v0 = vld [vmem:[#allocation2] sm:$0xff]  ;;  %v22_v1 = vld [vmem:[#allocation2 + $0x8] sm:$0xff] }
  0x13   :  { %s31_s19 = sshll.u32 %s91_s18, 4  ;;  %23 = vst [vmem:[#allocation5] sm:$0xff] %v21_v0  ;;  %24 = vst [vmem:[#allocation5 + $0x8] sm:$0xff] %v22_v1  ;;  %s32_s19 = int_to_ptr.vmem [resolvable:$true] %s31_s19 }
  0x14   :  { %s64_s20 = scalar_lea.vmem %s32_s19, 256  ;;  %p69_p9 = scmp.lt.s32.totalorder %s32_s19, %s32_s19 }
  0x15   :  { %p65_p8 = scmp.ne.s32.totalorder %s32_s19, %s64_s20  ;;  %p70_p10 = scmp.lt.s32.totalorder %s64_s20, %s64_s20 }
  0x17   :  { %p71_p11 = por %p70_p10, %p69_p9 }
  0x19   :  { %p72_p12 = pnand %p71_p11, %p65_p8 }
  0x1b   :  { %75 = shalt.err (!%p72_p12)
}
  0x1c   :  { %s76_s0 = scalar_lea.hbm %s127_s1, 256 }
  0x1d   :  { %p77_p13 = scmp.ne.s32.totalorder %s127_s1, %s76_s0  ;;  %p80_p0 = scmp.lt.u32.totalorder %s76_s0, %s127_s1 }
  0x1f   :  { %p82_p1 = pnand %p80_p0, %p77_p13 }
  0x21   :  { %85 = shalt.err (!%p82_p1)
}
  0x22   :  { %34 = dma.vmem_to_hbm [thread:$0]  %s32_s19, 256, %s127_s1, [#allocation4]  }
  0x23   :  { %88 = dma.done.wait [#allocation4], 256  }
  0x24   :  { %89 = vsyncadd [#allocation4], 4294967040 }
  0x25   :  { %38 = vsyncpa [#allocation3], 1 }
  0x26   :  { %39 = vsyncpa [#allocation4], 1 }

</bundles_post_ra>
